<compile_context>
chip_gen: v7x
topology: tpu7x:2x2x1
jax: 0.10.0
libtpu: 0.0.40
codegen_flags: <defaults>
</compile_context>

<pallas_src>
import jax
import jax.numpy as jnp
from jax.experimental import pallas as pl
from jax.experimental.pallas import tpu as pltpu

KGE_SIZE = 32
LN_EPS = 1e-5


def disc_hd_kernel(x_ref, kge_ref, wx_ref, wk_ref, p_ref, out_ref):
    x = x_ref[...]                # (TB, 24)  batch-major input tile (native dtype)
    kge = kge_ref[...]            # (TB, 32)
    wx = wx_ref[...]              # (24, 8)   folded:  patterns_T @ W0a_T
    wk = wk_ref[...]              # (32, 8)   W0b_T
    p = p_ref[...]                # (3, 8)    row0 = b0, row1 = w1' (gamma-folded),
                                  #           row2 = b1' replicated (only [2,0] is read)

    # Hidden layer on the MXU, batch-major, f32 accumulation regardless of input dtype.
    h = (jnp.dot(x, wx, preferred_element_type=jnp.float32)
         + jnp.dot(kge, wk, preferred_element_type=jnp.float32)
         + p[0:1, :])                                               # (TB, 8)

    # LayerNorm over the hidden dim = lane reduce over the 8 columns (biased variance).
    mean = jnp.mean(h, axis=1, keepdims=True)                       # (TB, 1)
    c = h - mean
    var = jnp.mean(c * c, axis=1, keepdims=True)                    # (TB, 1)
    z = c * jax.lax.rsqrt(var + LN_EPS)                             # (TB, 8)

    # Output head with gamma/beta folded into w1'/b1': VPU multiply + lane reduce.
    # (N=1 on the MXU would be ~0% utilized; all of this is free filler under the DMA.)
    logits = jnp.sum(z * p[1:2, :], axis=1, keepdims=True) + p[2:3, 0:1]   # (TB, 1)
    out_ref[...] = jax.nn.sigmoid(logits)


def _pack_kernel_params(params):
    """Fold the linear algebra once, outside the kernel (exact transformations)."""
    # Fold the pattern projection into Linear0's x-part.
    wx = (params["patterns_T"] @ params["w0a_T"]).astype(jnp.float32)        # (24, 8)
    wk = params["w0b_T"].astype(jnp.float32)                                 # (32, 8)
    hidden = wx.shape[1]

    # Fold the LayerNorm affine (gamma, beta) into the 8->1 head.
    gamma = params["gamma"].reshape(-1)                                      # (8,)
    w1 = params["w1_T"].reshape(-1)                                          # (8,)
    w1p = (gamma * w1).reshape(1, hidden)                                    # (1, 8)
    b1p = (params["beta"].reshape(1, -1) @ params["w1_T"]
           + params["b1"].reshape(1, 1))                                     # (1, 1)

    # Packed small params, batch-major friendly: rows = [b0 ; w1' ; b1' replicated].
    # NOTE: row 2 replicates the scalar b1' across all 8 columns; the kernel reads only
    # element [2, 0].  Keep this coupling in sync with disc_hd_kernel.
    small = jnp.concatenate(
        [params["b0"].reshape(1, hidden),
         w1p,
         jnp.broadcast_to(b1p, (1, hidden))],
        axis=0).astype(jnp.float32)                                          # (3, 8)
    return wx, wk, small


def discriminator_hd_forward(x, kge, params, *, max_tile=4096):
    """x: (B, pattern_length), kge: (B, KGE_SIZE) -> (B, 1) float32.

    Inputs are consumed in their native dtype (f32 or bf16) and layout — no wrapper-side
    concat / cast / transpose / pad, so the only HBM traffic is the inputs once + output.
    """
    B = x.shape[0]
    pattern_length = x.shape[1]
    wx, wk, small = _pack_kernel_params(params)
    hidden = wx.shape[1]

    # Batch tile (sublane axis of the batch-major blocks): multiple of 128, capped.
    # For small B this shrinks to one ragged block; for large B it amortizes the fixed
    # per-grid-step cost.  Sweep max_tile up to ~8192 on v6e/v7x (VMEM-limited by the
    # 24/32 -> 128 lane padding of the batch-major blocks; v5e keep <= 8192).
    tb = min(max_tile, ((B + 127) // 128) * 128)
    grid = (pl.cdiv(B, tb),)

    return pl.pallas_call(
        disc_hd_kernel,
        out_shape=jax.ShapeDtypeStruct((B, 1), jnp.float32),
        grid_spec=pltpu.PrefetchScalarGridSpec(
            num_scalar_prefetch=0,
            grid=grid,
            in_specs=[
                pl.BlockSpec((tb, pattern_length), lambda i: (i, 0)),   # x tile (streamed)
                pl.BlockSpec((tb, KGE_SIZE), lambda i: (i, 0)),         # kge tile (streamed)
                pl.BlockSpec((pattern_length, hidden), lambda i: (0, 0)),  # Wx (resident)
                pl.BlockSpec((KGE_SIZE, hidden), lambda i: (0, 0)),        # Wk (resident)
                pl.BlockSpec((3, hidden), lambda i: (0, 0)),               # packed small params
            ],
            out_specs=pl.BlockSpec((tb, 1), lambda i: (i, 0)),
        ),
        compiler_params=pltpu.CompilerParams(
            dimension_semantics=("parallel",),          # megacore sharding on v7x
            vmem_limit_bytes=48 * 1024 * 1024,          # covers tb up to ~8192; < v7x physical
        ),
    )(x, kge, wx, wk, small)


def init_params(key, pattern_num=32, pattern_length=24, hidden_size=8):
    """Deterministic synthetic parameter init mirroring the module's shapes."""
    k_pat, k_w0, k_b0, k_w1, k_b1 = jax.random.split(key, 5)

    # hd_patterns: orthogonal init (pattern_num, pattern_length)
    a = jax.random.normal(k_pat, (pattern_num, pattern_length), jnp.float32)
    q, _ = jnp.linalg.qr(a)
    hd_patterns = q.astype(jnp.float32)

    in0 = pattern_num + KGE_SIZE
    w0 = jax.random.normal(k_w0, (hidden_size, in0), jnp.float32) / jnp.sqrt(in0)
    b0 = jax.random.normal(k_b0, (hidden_size,), jnp.float32) * 0.01
    w1 = jax.random.normal(k_w1, (1, hidden_size), jnp.float32) / jnp.sqrt(hidden_size)
    b1 = jax.random.normal(k_b1, (1,), jnp.float32) * 0.01
    gamma = jnp.ones((hidden_size,), jnp.float32)
    beta = jnp.zeros((hidden_size,), jnp.float32)

    return {
        "patterns_T": hd_patterns.T,                    # (pattern_length, pattern_num)
        "w0a_T": w0[:, :pattern_num].T,                 # (pattern_num, hidden)
        "w0b_T": w0[:, pattern_num:].T,                 # (KGE_SIZE, hidden)
        "b0": b0.reshape(1, hidden_size),
        "gamma": gamma.reshape(1, hidden_size),
        "beta": beta.reshape(1, hidden_size),
        "w1_T": w1.T,                                   # (hidden, 1)
        "b1": b1.reshape(1, 1),
    }


def reference_forward(x, kge, params):
    """Pure-JAX reference in the original (unfolded, batch-major) form."""
    x_p = x @ params["patterns_T"]
    h = x_p @ params["w0a_T"] + kge @ params["w0b_T"] + params["b0"]
    mean = jnp.mean(h, axis=-1, keepdims=True)
    var = jnp.mean((h - mean) ** 2, axis=-1, keepdims=True)
    hn = (h - mean) / jnp.sqrt(var + LN_EPS) * params["gamma"] + params["beta"]
    return jax.nn.sigmoid(hn @ params["w1_T"] + params["b1"])


if __name__ == "__main__":
    PATTERN_NUM = 32
    PATTERN_LENGTH = 24
    HIDDEN = 8

    key = jax.random.PRNGKey(0)
    k_x, _, k_p = jax.random.split(key, 3)
    params = init_params(k_p, PATTERN_NUM, PATTERN_LENGTH, HIDDEN)

    ok = True
    # (B, max_tile): small, non-multiple-of-8 ragged, medium ragged, and a forced
    # multi-block ragged grid (600 rows with 256-row tiles -> 3 blocks, last one partial).
    for B, mt in ((8, 4096), (13, 4096), (200, 4096), (600, 256)):
        kx, kk = jax.random.split(jax.random.fold_in(k_x, B), 2)
        x = jax.random.normal(kx, (B, PATTERN_LENGTH), jnp.float32)
        kge = jax.random.normal(kk, (B, KGE_SIZE), jnp.float32)

        out = discriminator_hd_forward(x, kge, params, max_tile=mt)
        out = jax.block_until_ready(out)

        ref = reference_forward(x, kge, params)
        assert out.shape == (B, 1), out.shape
        ok &= bool(jnp.allclose(out, ref, atol=2e-5, rtol=2e-5))

    assert ok
    print("KERNEL_OK")
</pallas_src>

<mosaic_0001>
module attributes {stable_mosaic.version = 11 : i64} {
  func.func @disc_hd_kernel(%arg0: i32, %arg1: memref<128x24xf32, #tpu.memory_space<vmem>>, %arg2: memref<128x32xf32, #tpu.memory_space<vmem>>, %arg3: memref<24x8xf32, #tpu.memory_space<vmem>>, %arg4: memref<32x8xf32, #tpu.memory_space<vmem>>, %arg5: memref<3x8xf32, #tpu.memory_space<vmem>>, %arg6: memref<128x1xf32, #tpu.memory_space<vmem>>) attributes {dimension_semantics = [#tpu.dimension_semantics<parallel>], iteration_bounds = array<i64: 1>, scalar_prefetch = 0 : i64, scratch_operands = 0 : i64, tpu.core_type = #tpu.core_type<tc>, window_params = [{transform_indices = @transform_0, window_bounds = array<i64: 128, 24>}, {transform_indices = @transform_1, window_bounds = array<i64: 128, 32>}, {pipeline_mode = #tpu.pipeline_mode<synchronous>, transform_indices = @transform_2, window_bounds = array<i64: 24, 8>}, {pipeline_mode = #tpu.pipeline_mode<synchronous>, transform_indices = @transform_3, window_bounds = array<i64: 32, 8>}, {pipeline_mode = #tpu.pipeline_mode<synchronous>, transform_indices = @transform_4, window_bounds = array<i64: 3, 8>}, {transform_indices = @transform_5, window_bounds = array<i64: 128, 1>}]} {
    %c0 = arith.constant 0 : index
    %c0_0 = arith.constant 0 : index
    %0 = vector.load %arg1[%c0, %c0_0] : memref<128x24xf32, #tpu.memory_space<vmem>>, vector<128x24xf32>
    %c0_1 = arith.constant 0 : index
    %c0_2 = arith.constant 0 : index
    %1 = vector.load %arg2[%c0_1, %c0_2] : memref<128x32xf32, #tpu.memory_space<vmem>>, vector<128x32xf32>
    %c0_3 = arith.constant 0 : index
    %c0_4 = arith.constant 0 : index
    %2 = vector.load %arg3[%c0_3, %c0_4] : memref<24x8xf32, #tpu.memory_space<vmem>>, vector<24x8xf32>
    %c0_5 = arith.constant 0 : index
    %c0_6 = arith.constant 0 : index
    %3 = vector.load %arg4[%c0_5, %c0_6] : memref<32x8xf32, #tpu.memory_space<vmem>>, vector<32x8xf32>
    %c0_7 = arith.constant 0 : index
    %c0_8 = arith.constant 0 : index
    %4 = vector.load %arg5[%c0_7, %c0_8] : memref<3x8xf32, #tpu.memory_space<vmem>>, vector<3x8xf32>
    %cst = arith.constant dense<0.000000e+00> : vector<128x8xf32>
    %5 = tpu.matmul %0, %2, %cst {dimension_numbers = #tpu.dot_dimension_numbers<[1], [0], [0], [1], [0, 0, 1, 1], [], []>} : vector<128x24xf32>, vector<24x8xf32>, vector<128x8xf32> -> vector<128x8xf32>
    %cst_9 = arith.constant dense<0.000000e+00> : vector<128x8xf32>
    %6 = tpu.matmul %1, %3, %cst_9 {dimension_numbers = #tpu.dot_dimension_numbers<[1], [0], [0], [1], [0, 0, 1, 1], [], []>} : vector<128x32xf32>, vector<32x8xf32>, vector<128x8xf32> -> vector<128x8xf32>
    %7 = arith.addf %5, %6 : vector<128x8xf32>
    %8 = vector.extract_strided_slice %4 {offsets = [0, 0], sizes = [1, 8], strides = [1, 1]} : vector<3x8xf32> to vector<1x8xf32>
    %9 = vector.broadcast %8 : vector<1x8xf32> to vector<128x8xf32>
    %10 = arith.addf %7, %9 : vector<128x8xf32>
    %cst_10 = arith.constant dense<0.000000e+00> : vector<128xf32>
    %11 = vector.multi_reduction <add>, %10, %cst_10 [1] : vector<128x8xf32> to vector<128xf32>
    %12 = vector.shape_cast %11 : vector<128xf32> to vector<128x1xf32>
    %cst_11 = arith.constant 8.000000e+00 : f32
    %13 = vector.broadcast %cst_11 : f32 to vector<128x1xf32>
    %14 = arith.divf %12, %13 : vector<128x1xf32>
    %15 = vector.broadcast %14 : vector<128x1xf32> to vector<128x8xf32>
    %16 = arith.subf %10, %15 : vector<128x8xf32>
    %17 = arith.mulf %16, %16 : vector<128x8xf32>
    %cst_12 = arith.constant dense<0.000000e+00> : vector<128xf32>
    %18 = vector.multi_reduction <add>, %17, %cst_12 [1] : vector<128x8xf32> to vector<128xf32>
    %19 = vector.shape_cast %18 : vector<128xf32> to vector<128x1xf32>
    %cst_13 = arith.constant 8.000000e+00 : f32
    %20 = vector.broadcast %cst_13 : f32 to vector<128x1xf32>
    %21 = arith.divf %19, %20 : vector<128x1xf32>
    %cst_14 = arith.constant 9.99999974E-6 : f32
    %22 = vector.broadcast %cst_14 : f32 to vector<128x1xf32>
    %23 = arith.addf %21, %22 : vector<128x1xf32>
    %24 = math.rsqrt %23 : vector<128x1xf32>
    %25 = vector.broadcast %24 : vector<128x1xf32> to vector<128x8xf32>
    %26 = arith.mulf %16, %25 : vector<128x8xf32>
    %27 = vector.extract_strided_slice %4 {offsets = [1, 0], sizes = [1, 8], strides = [1, 1]} : vector<3x8xf32> to vector<1x8xf32>
    %28 = vector.broadcast %27 : vector<1x8xf32> to vector<128x8xf32>
    %29 = arith.mulf %26, %28 : vector<128x8xf32>
    %cst_15 = arith.constant dense<0.000000e+00> : vector<128xf32>
    %30 = vector.multi_reduction <add>, %29, %cst_15 [1] : vector<128x8xf32> to vector<128xf32>
    %31 = vector.shape_cast %30 : vector<128xf32> to vector<128x1xf32>
    %32 = vector.extract_strided_slice %4 {offsets = [2, 0], sizes = [1, 1], strides = [1, 1]} : vector<3x8xf32> to vector<1x1xf32>
    %33 = vector.broadcast %32 : vector<1x1xf32> to vector<128x1xf32>
    %34 = arith.addf %31, %33 : vector<128x1xf32>
    %35 = arith.negf %34 : vector<128x1xf32>
    %36 = math.exp %35 : vector<128x1xf32>
    %cst_16 = arith.constant 1.000000e+00 : f32
    %37 = vector.broadcast %cst_16 : f32 to vector<128x1xf32>
    %38 = arith.addf %37, %36 : vector<128x1xf32>
    %39 = arith.divf %37, %38 : vector<128x1xf32>
    %c0_17 = arith.constant 0 : index
    %c0_18 = arith.constant 0 : index
    %40 = vector.load %arg6[%c0_17, %c0_18] : memref<128x1xf32, #tpu.memory_space<vmem>>, vector<128x1xf32>
    tpu.vector_store %arg6[%c0_17, %c0_18], %39 {strides = array<i32>} : memref<128x1xf32, #tpu.memory_space<vmem>>, vector<128x1xf32>,
    return
  }
  func.func @transform_0(%arg0: i32) -> (i32, i32) {
    %c0_i32 = arith.constant 0 : i32
    %c0_i32_0 = arith.constant 0 : i32
    return %arg0, %c0_i32 : i32, i32
  }
  func.func @transform_1(%arg0: i32) -> (i32, i32) {
    %c0_i32 = arith.constant 0 : i32
    %c0_i32_0 = arith.constant 0 : i32
    return %arg0, %c0_i32 : i32, i32
  }
  func.func @transform_2(%arg0: i32) -> (i32, i32) {
    %c0_i32 = arith.constant 0 : i32
    %c0_i32_0 = arith.constant 0 : i32
    %c0_i32_1 = arith.constant 0 : i32
    return %c0_i32, %c0_i32_0 : i32, i32
  }
  func.func @transform_3(%arg0: i32) -> (i32, i32) {
    %c0_i32 = arith.constant 0 : i32
    %c0_i32_0 = arith.constant 0 : i32
    %c0_i32_1 = arith.constant 0 : i32
    return %c0_i32, %c0_i32_0 : i32, i32
  }
  func.func @transform_4(%arg0: i32) -> (i32, i32) {
    %c0_i32 = arith.constant 0 : i32
    %c0_i32_0 = arith.constant 0 : i32
    %c0_i32_1 = arith.constant 0 : i32
    return %c0_i32, %c0_i32_0 : i32, i32
  }
  func.func @transform_5(%arg0: i32) -> (i32, i32) {
    %c0_i32 = arith.constant 0 : i32
    %c0_i32_0 = arith.constant 0 : i32
    return %arg0, %c0_i32 : i32, i32
  }
}

</mosaic_0001>

<bundles_post_ra>
// kernel: tpu_custom_call.1
= control target key start
LH: loop header
LB: loop body
LE: loop exit
PB: predicated region body
PF: predicated region fallthrough
CT: control target
= control target key end

     0   :  { %vm254_vm0 = vcmask 195584   ;;  %vm60_vm1 = vcmask 261120   ;;  %v448_v42 = vlaneseq  ;;  %vm468_vm2 = vcmask 64512   ;;  %s1634_s0 = inlined_call_operand.vmem [shape: f32[8,24], index: 0, kind: input, shape index: {}]   ;;  %s1635_s1 = inlined_call_operand.vmem [shape: f32[8,32], index: 1, kind: input, shape index: {}]   ;;  %s1636_s2 = inlined_call_operand.vmem [shape: f32[24,8], index: 2, kind: input, shape index: {}]   ;;  %s1637_s3 = inlined_call_operand.vmem [shape: f32[32,8], index: 3, kind: input, shape index: {}]   ;;  %s1638_s4 = inlined_call_operand.vmem [shape: f32[3,8], index: 4, kind: input, shape index: {}]   ;;  %s1639_s5 = inlined_call_operand.vmem [shape: f32[8,1], index: 5, kind: output, shape index: {}]  }
   0x1   :  { %v55_v0 = vld [vmem:[%s1637_s3] sm:$0xff]  ;;  %v56_v1 = vld [vmem:[%s1637_s3 + $0x8] sm:$0xff]  ;;  %v57_v5 = vld [vmem:[%s1637_s3 + $0x10] sm:$0xff]  ;;  %vm862_vm3 = vcmask 7168  }
   0x2   :  { %v52_v2 = vld [vmem:[%s1636_s2] sm:$0xff]  ;;  %v1068_v3 = vpack.c.bf16 %v56_v1, %v55_v0  ;;  %v53_v4 = vld [vmem:[%s1636_s2 + $0x8] sm:$0xff]  ;;  %v58_v6 = vld [vmem:[%s1637_s3 + $0x18] sm:$0xff]  ;;  %v1371_v43 = vshrl.u32 %v448_v42, 7 }
   0x3   :  { %v1076_v7 = vpack.c.bf16 %v53_v4, %v52_v2  ;;  %v1072_v8 = vpack.c.bf16 %v58_v6, %v57_v5  ;;  %v20_v9 = vld [vmem:[%s1634_s0] sm:$0xff]  ;;  %v54_v10 = vld [vmem:[%s1636_s2 + $0x10] sm:$0xff]  ;;  %v21_v12 = vld [vmem:[%s1634_s0 + $0x8] sm:$0xff] }
   0x4   :  { %1069 = vmatprep.subr.bf16.mxu1 %v1068_v3  ;;  %1044 = vmatprep.mubr.msk.f32.mxu0 %vm254_vm0, %v20_v9  ;;  %v36_v11 = vld [vmem:[%s1635_s1] sm:$0xff]  ;;  %v37_v13 = vld [vmem:[%s1635_s1 + $0x8] sm:$0xff]  ;;  %v22_v14 = vld [vmem:[%s1634_s0 + $0x10] sm:$0xff]  ;;  %v450_v44 = vsub.s32 0, %v1371_v43 }
   0x5   :  { %1071 = vmatpush3.bf16.msra.mxu1 %v1068_v3  ;;  %1077 = vmatprep.subr.bf16.mxu0 %v1076_v7  ;;  %v38_v15 = vld [vmem:[%s1635_s1 + $0x10] sm:$0xff]  ;;  %v23_v16 = vld [vmem:[%s1634_s0 + $0x18] sm:$0xff]  ;;  %v24_v18 = vld [vmem:[%s1634_s0 + $0x20] sm:$0xff] }
   0x6   :  { %1079 = vmatpush3.bf16.msra.mxu0 %v1076_v7  ;;  %1073 = vmatprep.subr.bf16.mxu1 %v1072_v8  ;;  %v39_v17 = vld [vmem:[%s1635_s1 + $0x18] sm:$0xff]  ;;  %v40_v19 = vld [vmem:[%s1635_s1 + $0x20] sm:$0xff]  ;;  %v25_v20 = vld [vmem:[%s1634_s0 + $0x28] sm:$0xff] }
   0x7   :  { %1042 = vmatprep.subr.mxu0 %v54_v10  ;;  %1014 = vmatprep.mubr.msk.f32.mxu1 %vm60_vm1, %v36_v11  ;;  %v41_v21 = vld [vmem:[%s1635_s1 + $0x28] sm:$0xff]  ;;  %v26_v22 = vld [vmem:[%s1634_s0 + $0x30] sm:$0xff]  ;;  %v27_v24 = vld [vmem:[%s1634_s0 + $0x38] sm:$0xff] }
   0x8   :  { %v42_v23 = vld [vmem:[%s1635_s1 + $0x30] sm:$0xff]  ;;  %v43_v25 = vld [vmem:[%s1635_s1 + $0x38] sm:$0xff]  ;;  %v28_v26 = vld [vmem:[%s1634_s0 + $0x40] sm:$0xff] }
   0x9   :  { %1075 = vmatpush3.bf16.msra.mxu1 %v1072_v8  ;;  %v44_v27 = vld [vmem:[%s1635_s1 + $0x40] sm:$0xff]  ;;  %v29_v28 = vld [vmem:[%s1634_s0 + $0x48] sm:$0xff]  ;;  %v30_v30 = vld [vmem:[%s1634_s0 + $0x50] sm:$0xff] }
   0xa   :  { %1043 = vmatpush3.msra.mxu0 %v54_v10  ;;  %v45_v29 = vld [vmem:[%s1635_s1 + $0x48] sm:$0xff]  ;;  %v46_v31 = vld [vmem:[%s1635_s1 + $0x50] sm:$0xff]  ;;  %v31_v32 = vld [vmem:[%s1634_s0 + $0x58] sm:$0xff] }
   0xb   :  { %1045 = vmatmul.mubr.msk.f32.vlgmr.msra.gmra.mrb[0].mxu0 %vm254_vm0, %v21_v12  ;;  %v47_v33 = vld [vmem:[%s1635_s1 + $0x58] sm:$0xff]  ;;  %v32_v34 = vld [vmem:[%s1634_s0 + $0x60] sm:$0xff]  ;;  %v33_v36 = vld [vmem:[%s1634_s0 + $0x68] sm:$0xff] }
   0xc   :  { %1015 = vmatmul.mubr.msk.f32.vlgmr.msra.gmra.mrb[0].mxu1 %vm60_vm1, %v37_v13  ;;  %1047 = vmatprep.mubr.msk.f32.mxu0 %vm254_vm0, %v22_v14  ;;  %v48_v35 = vld [vmem:[%s1635_s1 + $0x60] sm:$0xff]  ;;  %v49_v37 = vld [vmem:[%s1635_s1 + $0x68] sm:$0xff]  ;;  %v34_v38 = vld [vmem:[%s1634_s0 + $0x70] sm:$0xff] }
   0xd   :  { %1017 = vmatprep.mubr.msk.f32.mxu1 %vm60_vm1, %v38_v15  ;;  %v50_v39 = vld [vmem:[%s1635_s1 + $0x70] sm:$0xff]  ;;  %v35_v40 = vld [vmem:[%s1634_s0 + $0x78] sm:$0xff]  ;;  %v1377_v45 = vld [vmem:[%s1638_s4] sm:$0x7] }
   0xe   :  { %v51_v41 = vld [vmem:[%s1635_s1 + $0x78] sm:$0xff]  ;;  %v1380_v47 = vrot.slane %v1377_v45, %v450_v44 }
   0xf   :  { %1048 = vmatmul.mubr.msk.f32.gmra.mrb[2].mxu0 %vm254_vm0, %v23_v16 }
  0x10   :  { %1018 = vmatmul.mubr.msk.f32.gmra.mrb[2].mxu1 %vm60_vm1, %v39_v17  ;;  %1050 = vmatprep.mubr.msk.f32.mxu0 %vm254_vm0, %v24_v18 }
  0x11   :  { %1020 = vmatprep.mubr.msk.f32.mxu1 %vm60_vm1, %v40_v19 }
  0x13   :  { %1051 = vmatmul.mubr.msk.f32.gmra.mrb[4].mxu0 %vm254_vm0, %v25_v20 }
  0x14   :  { %1021 = vmatmul.mubr.msk.f32.gmra.mrb[4].mxu1 %vm60_vm1, %v41_v21  ;;  %1053 = vmatprep.mubr.msk.f32.mxu0 %vm254_vm0, %v26_v22 }
  0x15   :  { %1023 = vmatprep.mubr.msk.f32.mxu1 %vm60_vm1, %v42_v23 }
  0x17   :  { %1054 = vmatmul.mubr.msk.f32.gmra.mrb[6].mxu0 %vm254_vm0, %v27_v24 }
  0x18   :  { %1024 = vmatmul.mubr.msk.f32.gmra.mrb[6].mxu1 %vm60_vm1, %v43_v25  ;;  %1056 = vmatprep.mubr.msk.f32.mxu0 %vm254_vm0, %v28_v26 }
  0x19   :  { %1026 = vmatprep.mubr.msk.f32.mxu1 %vm60_vm1, %v44_v27 }
  0x1b   :  { %1057 = vmatmul.mubr.msk.f32.gmra.mrb[8].mxu0 %vm254_vm0, %v29_v28 }
  0x1c   :  { %1027 = vmatmul.mubr.msk.f32.gmra.mrb[8].mxu1 %vm60_vm1, %v45_v29  ;;  %1059 = vmatprep.mubr.msk.f32.mxu0 %vm254_vm0, %v30_v30 }
  0x1d   :  { %1029 = vmatprep.mubr.msk.f32.mxu1 %vm60_vm1, %v46_v31 }
  0x1f   :  { %1060 = vmatmul.mubr.msk.f32.gmra.mrb[10].mxu0 %vm254_vm0, %v31_v32 }
  0x20   :  { %1030 = vmatmul.mubr.msk.f32.gmra.mrb[10].mxu1 %vm60_vm1, %v47_v33  ;;  %1062 = vmatprep.mubr.msk.f32.mxu0 %vm254_vm0, %v32_v34 }
  0x21   :  { %1032 = vmatprep.mubr.msk.f32.mxu1 %vm60_vm1, %v48_v35 }
  0x23   :  { %1063 = vmatmul.mubr.msk.f32.gmra.mrb[12].mxu0 %vm254_vm0, %v33_v36 }
  0x24   :  { %1033 = vmatmul.mubr.msk.f32.gmra.mrb[12].mxu1 %vm60_vm1, %v49_v37  ;;  %1065 = vmatprep.mubr.msk.f32.mxu0 %vm254_vm0, %v34_v38 }
  0x25   :  { %1035 = vmatprep.mubr.msk.f32.mxu1 %vm60_vm1, %v50_v39 }
  0x27   :  { %1066 = vmatmul.mubr.msk.f32.gmra.mrb[14].mxu0 %vm254_vm0, %v35_v40 }
  0x28   :  { %1036 = vmatmul.mubr.msk.f32.gmra.mrb[14].mxu1 %vm60_vm1, %v51_v41 }
  0xde   :  { %v1046_v46 = vpop.f32.mrb[0].mxu0 }
  0xdf   :  { %v1016_v48 = vpop.f32.mrb[0].mxu1  ;;  %v369_v49 = vpop.f32.mrb[1].mxu0 }
  0xe0   :  { %v375_v50 = vadd.f32 %v1046_v46, %v1016_v48  ;;  %v175_v51 = vpop.f32.mrb[1].mxu1 }
  0xe1   :  { %v370_v52 = vadd.f32 %v369_v49, %v175_v51 }
  0xe2   :  { %v1049_v53 = vpop.f32.mrb[2].mxu0  ;;  %v1383_v54 = vadd.f32 %v1380_v47, %v375_v50 }
  0xe3   :  { %v1019_v55 = vpop.f32.mrb[2].mxu1  ;;  %v379_v56 = vpop.f32.mrb[3].mxu0  ;;  %v1388_v60 = vadd.f32 %v1380_v47, %v370_v52 }
  0xe4   :  { %v385_v57 = vadd.f32 %v1049_v53, %v1019_v55  ;;  %v185_v58 = vpop.f32.mrb[3].mxu1  ;;  %v472_v59 = vsel %vm468_vm2, %v1383_v54, 0.0 }
  0xe5   :  { %v380_v61 = vadd.f32 %v379_v56, %v185_v58  ;;  %473 = vadd.xlane.f32.xlu0 %v472_v59  ;;  %v469_v5 = vsel %vm468_vm2, %v1388_v60, 0.0 }
  0xe6   :  { %v1052_v62 = vpop.f32.mrb[4].mxu0  ;;  %v1391_v63 = vadd.f32 %v1380_v47, %v385_v57 }
  0xe7   :  { %v1022_v0 = vpop.f32.mrb[4].mxu1  ;;  %v389_v1 = vpop.f32.mrb[5].mxu0  ;;  %v1398_v6 = vadd.f32 %v1380_v47, %v380_v61 }
  0xe8   :  { %v395_v2 = vadd.f32 %v1052_v62, %v1022_v0  ;;  %v195_v3 = vpop.f32.mrb[5].mxu1  ;;  %v478_v4 = vsel %vm468_vm2, %v1391_v63, 0.0 }
  0xe9   :  { %v390_v7 = vadd.f32 %v389_v1, %v195_v3  ;;  %479 = vadd.xlane.f32.xlu1 %v478_v4  ;;  %470 = vadd.xlane.f32.xlu0 %v469_v5  ;;  %v475_v15 = vsel %vm468_vm2, %v1398_v6, 0.0 }
  0xea   :  { %v1055_v8 = vpop.f32.mrb[6].mxu0  ;;  %v1401_v9 = vadd.f32 %v1380_v47, %v395_v2 }
  0xeb   :  { %v1025_v10 = vpop.f32.mrb[6].mxu1  ;;  %v399_v11 = vpop.f32.mrb[7].mxu0  ;;  %v1404_v12 = vadd.f32 %v1380_v47, %v390_v7 }
  0xec   :  { %v405_v13 = vadd.f32 %v1055_v8, %v1025_v10  ;;  %v205_v14 = vpop.f32.mrb[7].mxu1  ;;  %v484_v19 = vsel %vm468_vm2, %v1401_v9, 0.0 }
  0xed   :  { %v400_v16 = vadd.f32 %v399_v11, %v205_v14  ;;  %476 = vadd.xlane.f32.xlu1 %v475_v15  ;;  %v481_v17 = vsel %vm468_vm2, %v1404_v12, 0.0 }
  0xee   :  { %482 = vadd.xlane.f32.xlu0 %v481_v17  ;;  %v1058_v18 = vpop.f32.mrb[8].mxu0  ;;  %v1413_v20 = vadd.f32 %v1380_v47, %v405_v13 }
  0xef   :  { %v1028_v21 = vpop.f32.mrb[8].mxu1  ;;  %v409_v22 = vpop.f32.mrb[9].mxu0  ;;  %v1416_v23 = vadd.f32 %v1380_v47, %v400_v16 }
  0xf0   :  { %v415_v24 = vadd.f32 %v1058_v18, %v1028_v21  ;;  %v215_v25 = vpop.f32.mrb[9].mxu1  ;;  %v490_v29 = vsel %vm468_vm2, %v1413_v20, 0.0 }
  0xf1   :  { %v410_v26 = vadd.f32 %v409_v22, %v215_v25  ;;  %485 = vadd.xlane.f32.xlu1 %v484_v19  ;;  %v487_v27 = vsel %vm468_vm2, %v1416_v23, 0.0 }
  0xf2   :  { %488 = vadd.xlane.f32.xlu0 %v487_v27  ;;  %v1061_v28 = vpop.f32.mrb[10].mxu0  ;;  %v1423_v30 = vadd.f32 %v1380_v47, %v415_v24 }
  0xf3   :  { %v1031_v31 = vpop.f32.mrb[10].mxu1  ;;  %v419_v32 = vpop.f32.mrb[11].mxu0  ;;  %v1426_v33 = vadd.f32 %v1380_v47, %v410_v26 }
  0xf4   :  { %v425_v34 = vadd.f32 %v1061_v28, %v1031_v31  ;;  %v225_v35 = vpop.f32.mrb[11].mxu1  ;;  %v496_v39 = vsel %vm468_vm2, %v1423_v30, 0.0 }
  0xf5   :  { %v420_v36 = vadd.f32 %v419_v32, %v225_v35  ;;  %491 = vadd.xlane.f32.xlu1 %v490_v29  ;;  %v493_v37 = vsel %vm468_vm2, %v1426_v33, 0.0 }
  0xf6   :  { %494 = vadd.xlane.f32.xlu0 %v493_v37  ;;  %v1064_v38 = vpop.f32.mrb[12].mxu0  ;;  %v1433_v40 = vadd.f32 %v1380_v47, %v425_v34 }
  0xf7   :  { %v1034_v41 = vpop.f32.mrb[12].mxu1  ;;  %v429_v42 = vpop.f32.mrb[13].mxu0  ;;  %v1436_v44 = vadd.f32 %v1380_v47, %v420_v36 }
  0xf8   :  { %v435_v46 = vadd.f32 %v1064_v38, %v1034_v41  ;;  %v235_v48 = vpop.f32.mrb[13].mxu1  ;;  %v502_v52 = vsel %vm468_vm2, %v1433_v40, 0.0 }
  0xf9   :  { %v430_v49 = vadd.f32 %v429_v42, %v235_v48  ;;  %497 = vadd.xlane.f32.xlu1 %v496_v39  ;;  %v499_v50 = vsel %vm468_vm2, %v1436_v44, 0.0 }
  0xfa   :  { %500 = vadd.xlane.f32.xlu0 %v499_v50  ;;  %v1067_v51 = vpop.f32.mrb[14].mxu0  ;;  %v1443_v53 = vadd.f32 %v1380_v47, %v435_v46 }
  0xfb   :  { %v1037_v55 = vpop.f32.mrb[14].mxu1  ;;  %v439_v56 = vpop.f32.mrb[15].mxu0  ;;  %v1446_v57 = vadd.f32 %v1380_v47, %v430_v49 }
  0xfc   :  { %v445_v58 = vadd.f32 %v1067_v51, %v1037_v55  ;;  %v245_v59 = vpop.f32.mrb[15].mxu1  ;;  %v508_v0 = vsel %vm468_vm2, %v1443_v53, 0.0 }
  0xfd   :  { %v440_v61 = vadd.f32 %v439_v56, %v245_v59  ;;  %503 = vadd.xlane.f32.xlu1 %v502_v52  ;;  %v505_v62 = vsel %vm468_vm2, %v1446_v57, 0.0 }
  0xfe   :  { %506 = vadd.xlane.f32.xlu0 %v505_v62  ;;  %v1453_v1 = vadd.f32 %v1380_v47, %v445_v58 }
  0xff   :  { %v1456_v2 = vadd.f32 %v1380_v47, %v440_v61 }
 0x100   :  { %v514_v4 = vsel %vm468_vm2, %v1453_v1, 0.0 }
 0x101   :  { %509 = vadd.xlane.f32.xlu1 %v508_v0  ;;  %v511_v3 = vsel %vm468_vm2, %v1456_v2, 0.0 }
 0x102   :  { %512 = vadd.xlane.f32.xlu0 %v511_v3 }
 0x105   :  { %515 = vadd.xlane.f32.xlu1 %v514_v4 }
 0x172   :  { %v474_v5 = vpop.xlane.xlu0 %473 }
 0x173   :  { %v519_v7 = vmul.f32 0.125, %v474_v5 }
 0x175   :  { %v1463_v8 = vsub.f32 %v1383_v54, %v519_v7 }
 0x176   :  { %v480_v10 = vpop.xlane.xlu1 %479  ;;  %v471_v11 = vpop.xlane.xlu0 %470 }
 0x177   :  { %v521_v13 = vmul.f32 0.125, %v480_v10  ;;  %v518_v14 = vmul.f32 0.125, %v471_v11  ;;  %v551_v47 = vmul.f32 %v1463_v8, %v1463_v8 }
 0x179   :  { %v1468_v15 = vsub.f32 %v1391_v63, %v521_v13  ;;  %v1471_v16 = vsub.f32 %v1388_v60, %v518_v14  ;;  %v569_v17 = vsel %vm468_vm2, %v551_v47, 0.0 }
 0x17a   :  { %570 = vadd.xlane.f32.xlu1 %v569_v17  ;;  %v477_v18 = vpop.xlane.xlu1 %476 }
 0x17b   :  { %v520_v19 = vmul.f32 0.125, %v477_v18  ;;  %v483_v54 = vpop.xlane.xlu0 %482  ;;  %v553_v21 = vmul.f32 %v1468_v15, %v1468_v15  ;;  %v550_v22 = vmul.f32 %v1471_v16, %v1471_v16 }
 0x17c   :  { %v522_v24 = vmul.f32 0.125, %v483_v54 }
 0x17d   :  { %v1479_v25 = vsub.f32 %v1398_v6, %v520_v19  ;;  %v575_v63 = vsel %vm468_vm2, %v553_v21, 0.0  ;;  %v566_v60 = vsel %vm468_vm2, %v550_v22, 0.0 }
 0x17e   :  { %v1484_v26 = vsub.f32 %v1404_v12, %v522_v24  ;;  %576 = vadd.xlane.f32.xlu1 %v575_v63  ;;  %v486_v27 = vpop.xlane.xlu1 %485  ;;  %567 = vadd.xlane.f32.xlu0 %v566_v60 }
 0x17f   :  { %v523_v28 = vmul.f32 0.125, %v486_v27  ;;  %v489_v29 = vpop.xlane.xlu0 %488  ;;  %v552_v31 = vmul.f32 %v1479_v25, %v1479_v25 }
 0x180   :  { %v524_v32 = vmul.f32 0.125, %v489_v29  ;;  %v554_v35 = vmul.f32 %v1484_v26, %v1484_v26 }
 0x181   :  { %v1489_v34 = vsub.f32 %v1401_v9, %v523_v28  ;;  %v572_v6 = vsel %vm468_vm2, %v552_v31, 0.0 }
 0x182   :  { %v1495_v12 = vsub.f32 %v1416_v23, %v524_v32  ;;  %v492_v36 = vpop.xlane.xlu1 %491  ;;  %573 = vadd.xlane.f32.xlu0 %v572_v6  ;;  %v578_v46 = vsel %vm468_vm2, %v554_v35, 0.0 }
 0x183   :  { %v525_v37 = vmul.f32 0.125, %v492_v36  ;;  %v495_v38 = vpop.xlane.xlu0 %494  ;;  %v555_v39 = vmul.f32 %v1489_v34, %v1489_v34 }
 0x184   :  { %v526_v41 = vmul.f32 0.125, %v495_v38  ;;  %v556_v48 = vmul.f32 %v1495_v12, %v1495_v12 }
 0x185   :  { %v1500_v42 = vsub.f32 %v1413_v20, %v525_v37  ;;  %v581_v9 = vsel %vm468_vm2, %v555_v39, 0.0 }
 0x186   :  { %v1507_v23 = vsub.f32 %v1426_v33, %v526_v41  ;;  %582 = vadd.xlane.f32.xlu1 %v581_v9  ;;  %v498_v49 = vpop.xlane.xlu1 %497  ;;  %579 = vadd.xlane.f32.xlu0 %v578_v46  ;;  %v584_v58 = vsel %vm468_vm2, %v556_v48, 0.0  ;;  %v680_v46 = vsub.s32 1, %v1371_v43 }
 0x187   :  { %v527_v50 = vmul.f32 0.125, %v498_v49  ;;  %v501_v51 = vpop.xlane.xlu0 %500  ;;  %v557_v52 = vmul.f32 %v1500_v42, %v1500_v42 }
 0x188   :  { %v528_v20 = vmul.f32 0.125, %v501_v51  ;;  %v558_v33 = vmul.f32 %v1507_v23, %v1507_v23 }
 0x189   :  { %v1512_v55 = vsub.f32 %v1423_v30, %v527_v50  ;;  %v587_v56 = vsel %vm468_vm2, %v557_v52, 0.0 }
 0x18a   :  { %v1519_v59 = vsub.f32 %v1436_v44, %v528_v20  ;;  %588 = vadd.xlane.f32.xlu1 %v587_v56  ;;  %v504_v61 = vpop.xlane.xlu1 %503  ;;  %585 = vadd.xlane.f32.xlu0 %v584_v58  ;;  %v590_v7 = vsel %vm468_vm2, %v558_v33, 0.0  ;;  %v1560_v20 = vrot.slane %v1377_v45, %v680_v46 }
 0x18b   :  { %v529_v62 = vmul.f32 0.125, %v504_v61  ;;  %v507_v0 = vpop.xlane.xlu0 %506  ;;  %v559_v3 = vmul.f32 %v1512_v55, %v1512_v55 }
 0x18c   :  { %v530_v30 = vmul.f32 0.125, %v507_v0  ;;  %v560_v44 = vmul.f32 %v1519_v59, %v1519_v59 }
 0x18d   :  { %v1524_v4 = vsub.f32 %v1433_v40, %v529_v62  ;;  %v593_v5 = vsel %vm468_vm2, %v559_v3, 0.0 }
 0x18e   :  { %v1531_v10 = vsub.f32 %v1446_v57, %v530_v30  ;;  %594 = vadd.xlane.f32.xlu1 %v593_v5  ;;  %v510_v11 = vpop.xlane.xlu1 %509  ;;  %591 = vadd.xlane.f32.xlu0 %v590_v7  ;;  %v596_v19 = vsel %vm468_vm2, %v560_v44, 0.0 }
 0x18f   :  { %v531_v13 = vmul.f32 0.125, %v510_v11  ;;  %v513_v14 = vpop.xlane.xlu0 %512  ;;  %v561_v47 = vmul.f32 %v1524_v4, %v1524_v4 }
 0x190   :  { %v532_v40 = vmul.f32 0.125, %v513_v14  ;;  %v562_v57 = vmul.f32 %v1531_v10, %v1531_v10 }
 0x191   :  { %v1536_v17 = vsub.f32 %v1443_v53, %v531_v13  ;;  %v599_v18 = vsel %vm468_vm2, %v561_v47, 0.0 }
 0x192   :  { %v1543_v54 = vsub.f32 %v1456_v2, %v532_v40  ;;  %600 = vadd.xlane.f32.xlu1 %v599_v18  ;;  %v516_v21 = vpop.xlane.xlu1 %515  ;;  %597 = vadd.xlane.f32.xlu0 %v596_v19  ;;  %v602_v60 = vsel %vm468_vm2, %v562_v57, 0.0 }
 0x193   :  { %v533_v22 = vmul.f32 0.125, %v516_v21  ;;  %v563_v24 = vmul.f32 %v1536_v17, %v1536_v17 }
 0x194   :  { %v564_v27 = vmul.f32 %v1543_v54, %v1543_v54 }
 0x195   :  { %v1548_v53 = vsub.f32 %v1453_v1, %v533_v22  ;;  %v605_v63 = vsel %vm468_vm2, %v563_v24, 0.0 }
 0x196   :  { %606 = vadd.xlane.f32.xlu1 %v605_v63  ;;  %603 = vadd.xlane.f32.xlu0 %v602_v60  ;;  %v608_v29 = vsel %vm468_vm2, %v564_v27, 0.0 }
 0x197   :  { %v565_v2 = vmul.f32 %v1548_v53, %v1548_v53 }
 0x199   :  { %v611_v28 = vsel %vm468_vm2, %v565_v2, 0.0 }
 0x19a   :  { %612 = vadd.xlane.f32.xlu1 %v611_v28  ;;  %609 = vadd.xlane.f32.xlu0 %v608_v29 }
 0x207   :  { %v571_v1 = vpop.xlane.xlu1 %570 }
 0x208   :  { %v615_v31 = vmul.f32 0.125, %v571_v1 }
 0x20a   :  { %v631_v32 = vadd.f32 1e-05, %v615_v31 }
 0x20b   :  { %v577_v6 = vpop.xlane.xlu1 %576  ;;  %v568_v35 = vpop.xlane.xlu0 %567 }
 0x20c   :  { %1096 = vrsqrt.f32 %v631_v32  ;;  %v617_v36 = vmul.f32 0.125, %v577_v6  ;;  %v614_v37 = vmul.f32 0.125, %v568_v35 }
 0x20e   :  { %v633_v38 = vadd.f32 1e-05, %v617_v36  ;;  %v630_v39 = vadd.f32 1e-05, %v614_v37 }
 0x20f   :  { %v574_v41 = vpop.xlane.xlu0 %573 }
 0x210   :  { %1098 = vrsqrt.f32 %v633_v38  ;;  %v616_v9 = vmul.f32 0.125, %v574_v41 }
 0x211   :  { %1100 = vrsqrt.f32 %v630_v39 }
 0x212   :  { %v632_v48 = vadd.f32 1e-05, %v616_v9 }
 0x213   :  { %v583_v49 = vpop.xlane.xlu1 %582  ;;  %v580_v50 = vpop.xlane.xlu0 %579 }
 0x214   :  { %1102 = vrsqrt.f32 %v632_v48  ;;  %v619_v51 = vmul.f32 0.125, %v583_v49  ;;  %v618_v52 = vmul.f32 0.125, %v580_v50 }
 0x216   :  { %v1097_v56 = vpop.eup %1096  ;;  %v635_v58 = vadd.f32 1e-05, %v619_v51  ;;  %v634_v33 = vadd.f32 1e-05, %v618_v52 }
 0x217   :  { %v589_v61 = vpop.xlane.xlu1 %588  ;;  %v586_v62 = vpop.xlane.xlu0 %585  ;;  %v663_v0 = vmul.f32 %v1097_v56, %v1463_v8 }
 0x218   :  { %1104 = vrsqrt.f32 %v635_v58  ;;  %v621_v3 = vmul.f32 0.125, %v589_v61  ;;  %v620_v30 = vmul.f32 0.125, %v586_v62 }
 0x219   :  { %1106 = vrsqrt.f32 %v634_v33  ;;  %v683_v5 = vmul.f32 %v1560_v20, %v663_v0 }
 0x21a   :  { %v1099_v7 = vpop.eup %1098  ;;  %v637_v44 = vadd.f32 1e-05, %v621_v3  ;;  %v636_v11 = vadd.f32 1e-05, %v620_v30 }
 0x21b   :  { %v1101_v13 = vpop.eup %1100  ;;  %v595_v14 = vpop.xlane.xlu1 %594  ;;  %v701_v40 = vsel %vm468_vm2, %v683_v5, 0.0  ;;  %v665_v18 = vmul.f32 %v1099_v7, %v1468_v15 }
 0x21c   :  { %v592_v47 = vpop.xlane.xlu0 %591  ;;  %1108 = vrsqrt.f32 %v637_v44  ;;  %v623_v19 = vmul.f32 0.125, %v595_v14  ;;  %702 = vadd.xlane.f32.xlu1 %v701_v40  ;;  %v662_v8 = vmul.f32 %v1101_v13, %v1471_v16 }
 0x21d   :  { %v622_v57 = vmul.f32 0.125, %v592_v47  ;;  %1110 = vrsqrt.f32 %v636_v11  ;;  %v685_v21 = vmul.f32 %v1560_v20, %v665_v18 }
 0x21e   :  { %v1103_v22 = vpop.eup %1102  ;;  %v639_v24 = vadd.f32 1e-05, %v623_v19  ;;  %v682_v60 = vmul.f32 %v1560_v20, %v662_v8 }
 0x21f   :  { %v638_v63 = vadd.f32 1e-05, %v622_v57  ;;  %v601_v27 = vpop.xlane.xlu1 %600  ;;  %v707_v28 = vsel %vm468_vm2, %v685_v21, 0.0  ;;  %v664_v15 = vmul.f32 %v1103_v22, %v1479_v25 }
 0x220   :  { %v598_v2 = vpop.xlane.xlu0 %597  ;;  %1112 = vrsqrt.f32 %v639_v24  ;;  %v625_v29 = vmul.f32 0.125, %v601_v27  ;;  %708 = vadd.xlane.f32.xlu1 %v707_v28  ;;  %v698_v16 = vsel %vm468_vm2, %v682_v60, 0.0 }
 0x221   :  { %v624_v1 = vmul.f32 0.125, %v598_v2  ;;  %1114 = vrsqrt.f32 %v638_v63  ;;  %699 = vadd.xlane.f32.xlu0 %v698_v16  ;;  %v684_v31 = vmul.f32 %v1560_v20, %v664_v15 }
 0x222   :  { %v1105_v32 = vpop.eup %1104  ;;  %v641_v6 = vadd.f32 1e-05, %v625_v29 }
 0x223   :  { %v640_v35 = vadd.f32 1e-05, %v624_v1  ;;  %v1107_v36 = vpop.eup %1106  ;;  %v607_v37 = vpop.xlane.xlu1 %606  ;;  %v704_v39 = vsel %vm468_vm2, %v684_v31, 0.0  ;;  %v667_v25 = vmul.f32 %v1105_v32, %v1489_v34 }
 0x224   :  { %v604_v38 = vpop.xlane.xlu0 %603  ;;  %1116 = vrsqrt.f32 %v641_v6  ;;  %v627_v41 = vmul.f32 0.125, %v607_v37  ;;  %v666_v46 = vmul.f32 %v1107_v36, %v1484_v26  ;;  %v748_v37 = vsub.s32 2, %v1371_v43 }
 0x225   :  { %v626_v9 = vmul.f32 0.125, %v604_v38  ;;  %1118 = vrsqrt.f32 %v640_v35  ;;  %705 = vadd.xlane.f32.xlu0 %v704_v39  ;;  %v687_v48 = vmul.f32 %v1560_v20, %v667_v25 }
 0x226   :  { %v1109_v49 = vpop.eup %1108  ;;  %v643_v50 = vadd.f32 1e-05, %v627_v41  ;;  %v686_v52 = vmul.f32 %v1560_v20, %v666_v46 }
 0x227   :  { %v642_v51 = vadd.f32 1e-05, %v626_v9  ;;  %v1111_v56 = vpop.eup %1110  ;;  %v613_v58 = vpop.xlane.xlu1 %612  ;;  %v713_v61 = vsel %vm468_vm2, %v687_v48, 0.0  ;;  %v669_v34 = vmul.f32 %v1109_v49, %v1500_v42 }
 0x228   :  { %v610_v33 = vpop.xlane.xlu0 %609  ;;  %1120 = vrsqrt.f32 %v643_v50  ;;  %v629_v62 = vmul.f32 0.125, %v613_v58  ;;  %714 = vadd.xlane.f32.xlu1 %v713_v61  ;;  %v710_v26 = vsel %vm468_vm2, %v686_v52, 0.0  ;;  %v668_v30 = vmul.f32 %v1111_v56, %v1495_v12 }
 0x229   :  { %v628_v0 = vmul.f32 0.125, %v610_v33  ;;  %1122 = vrsqrt.f32 %v642_v51  ;;  %711 = vadd.xlane.f32.xlu0 %v710_v26  ;;  %v689_v3 = vmul.f32 %v1560_v20, %v669_v34 }
 0x22a   :  { %v1113_v5 = vpop.eup %1112  ;;  %v645_v7 = vadd.f32 1e-05, %v629_v62  ;;  %v688_v42 = vmul.f32 %v1560_v20, %v668_v30 }
 0x22b   :  { %v644_v44 = vadd.f32 1e-05, %v628_v0  ;;  %v1115_v11 = vpop.eup %1114  ;;  %v719_v13 = vsel %vm468_vm2, %v689_v3, 0.0  ;;  %v671_v14 = vmul.f32 %v1113_v5, %v1512_v55 }
 0x22c   :  { %1124 = vrsqrt.f32 %v645_v7  ;;  %720 = vadd.xlane.f32.xlu1 %v719_v13  ;;  %v670_v47 = vmul.f32 %v1115_v11, %v1507_v23  ;;  %v716_v40 = vsel %vm468_vm2, %v688_v42, 0.0 }
 0x22d   :  { %1126 = vrsqrt.f32 %v644_v44  ;;  %v691_v18 = vmul.f32 %v1560_v20, %v671_v14  ;;  %717 = vadd.xlane.f32.xlu0 %v716_v40 }
 0x22e   :  { %v1117_v12 = vpop.eup %1116  ;;  %v690_v19 = vmul.f32 %v1560_v20, %v670_v47 }
 0x22f   :  { %v1119_v57 = vpop.eup %1118  ;;  %v725_v8 = vsel %vm468_vm2, %v691_v18, 0.0  ;;  %v673_v21 = vmul.f32 %v1117_v12, %v1524_v4 }
 0x230   :  { %726 = vadd.xlane.f32.xlu1 %v725_v8  ;;  %v722_v55 = vsel %vm468_vm2, %v690_v19, 0.0  ;;  %v672_v22 = vmul.f32 %v1119_v57, %v1519_v59 }
 0x231   :  { %v693_v23 = vmul.f32 %v1560_v20, %v673_v21  ;;  %723 = vadd.xlane.f32.xlu0 %v722_v55 }
 0x232   :  { %v1121_v24 = vpop.eup %1120  ;;  %v692_v63 = vmul.f32 %v1560_v20, %v672_v22 }
 0x233   :  { %v1123_v60 = vpop.eup %1122  ;;  %v731_v27 = vsel %vm468_vm2, %v693_v23, 0.0  ;;  %v675_v2 = vmul.f32 %v1121_v24, %v1536_v17 }
 0x234   :  { %732 = vadd.xlane.f32.xlu1 %v731_v27  ;;  %v728_v28 = vsel %vm468_vm2, %v692_v63, 0.0  ;;  %v674_v4 = vmul.f32 %v1123_v60, %v1531_v10 }
 0x235   :  { %v695_v15 = vmul.f32 %v1560_v20, %v675_v2  ;;  %729 = vadd.xlane.f32.xlu0 %v728_v28 }
 0x236   :  { %v1125_v29 = vpop.eup %1124  ;;  %v694_v59 = vmul.f32 %v1560_v20, %v674_v4 }
 0x237   :  { %v1127_v1 = vpop.eup %1126  ;;  %v737_v16 = vsel %vm468_vm2, %v695_v15, 0.0  ;;  %v677_v31 = vmul.f32 %v1125_v29, %v1548_v53  ;;  %v1612_v53 = vrot.slane %v1377_v45, %v748_v37 }
 0x238   :  { %738 = vadd.xlane.f32.xlu1 %v737_v16  ;;  %v734_v32 = vsel %vm468_vm2, %v694_v59, 0.0  ;;  %v676_v17 = vmul.f32 %v1127_v1, %v1543_v54 }
 0x239   :  { %v697_v6 = vmul.f32 %v1560_v20, %v677_v31  ;;  %735 = vadd.xlane.f32.xlu0 %v734_v32 }
 0x23a   :  { %v696_v10 = vmul.f32 %v1560_v20, %v676_v17 }
 0x23b   :  { %v743_v35 = vsel %vm468_vm2, %v697_v6, 0.0 }
 0x23c   :  { %744 = vadd.xlane.f32.xlu1 %v743_v35  ;;  %v740_v36 = vsel %vm468_vm2, %v696_v10, 0.0 }
 0x23d   :  { %741 = vadd.xlane.f32.xlu0 %v740_v36 }
 0x2a9   :  { %v703_v38 = vpop.xlane.xlu1 %702 }
 0x2aa   :  { %v751_v39 = vadd.f32 %v1612_v53, %v703_v38 }
 0x2ac   :  { %v952_v54 = vmul.f32 -1.442695, %v751_v39 }
 0x2ad   :  { %v709_v25 = vpop.xlane.xlu1 %708 }
 0x2ae   :  { %1128 = vpow2.f32 %v952_v54  ;;  %v753_v41 = vadd.f32 %v1612_v53, %v709_v25  ;;  %v700_v20 = vpop.xlane.xlu0 %699 }
 0x2af   :  { %v750_v9 = vadd.f32 %v1612_v53, %v700_v20 }
 0x2b0   :  { %v954_v46 = vmul.f32 -1.442695, %v753_v41 }
 0x2b1   :  { %v951_v48 = vmul.f32 -1.442695, %v750_v9 }
 0x2b2   :  { %1130 = vpow2.f32 %v954_v46  ;;  %v706_v49 = vpop.xlane.xlu0 %705 }
 0x2b3   :  { %1132 = vpow2.f32 %v951_v48  ;;  %v752_v43 = vadd.f32 %v1612_v53, %v706_v49 }
 0x2b5   :  { %v953_v45 = vmul.f32 -1.442695, %v752_v43  ;;  %v715_v50 = vpop.xlane.xlu1 %714 }
 0x2b6   :  { %v755_v51 = vadd.f32 %v1612_v53, %v715_v50  ;;  %v712_v52 = vpop.xlane.xlu0 %711 }
 0x2b7   :  { %1134 = vpow2.f32 %v953_v45  ;;  %v754_v56 = vadd.f32 %v1612_v53, %v712_v52 }
 0x2b8   :  { %v1129_v58 = vpop.eup %1128  ;;  %v956_v33 = vmul.f32 -1.442695, %v755_v51 }
 0x2b9   :  { %v815_v61 = vadd.f32 1.0, %v1129_v58  ;;  %v955_v34 = vmul.f32 -1.442695, %v754_v56  ;;  %v721_v62 = vpop.xlane.xlu1 %720 }
 0x2ba   :  { %1136 = vpow2.f32 %v956_v33  ;;  %v757_v0 = vadd.f32 %v1612_v53, %v721_v62  ;;  %v718_v26 = vpop.xlane.xlu0 %717 }
 0x2bb   :  { %1138 = vrcp.f32 %v815_v61  ;;  %v756_v5 = vadd.f32 %v1612_v53, %v718_v26 }
 0x2bc   :  { %v1131_v3 = vpop.eup %1130  ;;  %1140 = vpow2.f32 %v955_v34  ;;  %v958_v30 = vmul.f32 -1.442695, %v757_v0 }
 0x2bd   :  { %v1133_v7 = vpop.eup %1132  ;;  %v817_v44 = vadd.f32 1.0, %v1131_v3  ;;  %v727_v11 = vpop.xlane.xlu1 %726  ;;  %v957_v42 = vmul.f32 -1.442695, %v756_v5 }
 0x2be   :  { %v814_v13 = vadd.f32 1.0, %v1133_v7  ;;  %1142 = vpow2.f32 %v958_v30  ;;  %v759_v14 = vadd.f32 %v1612_v53, %v727_v11  ;;  %v724_v47 = vpop.xlane.xlu0 %723 }
 0x2bf   :  { %1144 = vrcp.f32 %v817_v44  ;;  %v758_v18 = vadd.f32 %v1612_v53, %v724_v47 }
 0x2c0   :  { %1146 = vrcp.f32 %v814_v13  ;;  %v960_v40 = vmul.f32 -1.442695, %v759_v14 }
 0x2c1   :  { %v1135_v12 = vpop.eup %1134  ;;  %1148 = vpow2.f32 %v957_v42  ;;  %v733_v19 = vpop.xlane.xlu1 %732  ;;  %v959_v8 = vmul.f32 -1.442695, %v758_v18 }
 0x2c2   :  { %v816_v57 = vadd.f32 1.0, %v1135_v12  ;;  %1150 = vpow2.f32 %v960_v40  ;;  %v761_v21 = vadd.f32 %v1612_v53, %v733_v19  ;;  %v730_v55 = vpop.xlane.xlu0 %729 }
 0x2c3   :  { %v760_v24 = vadd.f32 %v1612_v53, %v730_v55 }
 0x2c4   :  { %v1137_v22 = vpop.eup %1136  ;;  %1152 = vrcp.f32 %v816_v57  ;;  %v962_v23 = vmul.f32 -1.442695, %v761_v21 }
 0x2c5   :  { %v1139_v63 = vpop.eup %1138  ;;  %v819_v60 = vadd.f32 1.0, %v1137_v22  ;;  %1154 = vpow2.f32 %v959_v8  ;;  %v739_v27 = vpop.xlane.xlu1 %738  ;;  %v961_v28 = vmul.f32 -1.442695, %v760_v24 }
 0x2c6   :  { %v1141_v2 = vpop.eup %1140  ;;  %1156 = vpow2.f32 %v962_v23  ;;  %v763_v4 = vadd.f32 %v1612_v53, %v739_v27  ;;  %v736_v29 = vpop.xlane.xlu0 %735 }
 0x2c7   :  { %1158 = vrcp.f32 %v819_v60  ;;  %v818_v15 = vadd.f32 1.0, %v1141_v2  ;;  %v762_v16 = vadd.f32 %v1612_v53, %v736_v29 }
 0x2c8   :  { %v1143_v59 = vpop.eup %1142  ;;  %1160 = vpow2.f32 %v961_v28  ;;  %v964_v1 = vmul.f32 -1.442695, %v763_v4 }
 0x2c9   :  { %v1145_v31 = vpop.eup %1144  ;;  %1162 = vrcp.f32 %v818_v15  ;;  %v821_v32 = vadd.f32 1.0, %v1143_v59  ;;  %v745_v17 = vpop.xlane.xlu1 %744  ;;  %v963_v10 = vmul.f32 -1.442695, %v762_v16 }
 0x2ca   :  { %v1147_v6 = vpop.eup %1146  ;;  %1164 = vpow2.f32 %v964_v1  ;;  %v765_v35 = vadd.f32 %v1612_v53, %v745_v17  ;;  %v742_v37 = vpop.xlane.xlu0 %741 }
 0x2cb   :  { %v1149_v36 = vpop.eup %1148  ;;  %863 = vst.msk [vmem:[#allocation2] sm:$0xff] %vm862_vm3, %v1147_v6  ;;  %1166 = vrcp.f32 %v821_v32  ;;  %v764_v25 = vadd.f32 %v1612_v53, %v742_v37 }
 0x2cc   :  { %v1151_v38 = vpop.eup %1150  ;;  %v820_v39 = vadd.f32 1.0, %v1149_v36  ;;  %1168 = vpow2.f32 %v963_v10  ;;  %v966_v54 = vmul.f32 -1.442695, %v765_v35 }
 0x2cd   :  { %v823_v41 = vadd.f32 1.0, %v1151_v38  ;;  %v965_v9 = vmul.f32 -1.442695, %v764_v25 }
 0x2ce   :  { %v1153_v20 = vpop.eup %1152  ;;  %1170 = vrcp.f32 %v820_v39 }
 0x2cf   :  { %v1155_v46 = vpop.eup %1154  ;;  %1172 = vrcp.f32 %v823_v41 }
 0x2d0   :  { %v1157_v48 = vpop.eup %1156  ;;  %v822_v49 = vadd.f32 1.0, %v1155_v46  ;;  %1174 = vpow2.f32 %v966_v54 }
 0x2d1   :  { %v1159_v43 = vpop.eup %1158  ;;  %v825_v45 = vadd.f32 1.0, %v1157_v48  ;;  %1176 = vpow2.f32 %v965_v9 }
 0x2d2   :  { %v1161_v50 = vpop.eup %1160  ;;  %v908_v51 = vld [vmem:[#allocation2] sm:$0xff]  ;;  %1178 = vrcp.f32 %v822_v49 }
 0x2d3   :  { %v1163_v52 = vpop.eup %1162  ;;  %909 = vst [vmem:[%s1639_s5] sm:$0xff] %v908_v51  ;;  %1180 = vrcp.f32 %v825_v45  ;;  %v824_v53 = vadd.f32 1.0, %v1161_v50 }
 0x2d4   :  { %v1165_v56 = vpop.eup %1164 }
 0x2d5   :  { %v1167_v58 = vpop.eup %1166  ;;  %1182 = vrcp.f32 %v824_v53  ;;  %v827_v33 = vadd.f32 1.0, %v1165_v56 }
 0x2d6   :  { %v1169_v61 = vpop.eup %1168 }
 0x2d7   :  { %1184 = vrcp.f32 %v827_v33  ;;  %v826_v34 = vadd.f32 1.0, %v1169_v61 }
 0x2d8   :  { %v1171_v62 = vpop.eup %1170 }
 0x2d9   :  { %v1173_v0 = vpop.eup %1172  ;;  %1186 = vrcp.f32 %v826_v34 }
 0x2da   :  { %v1175_v26 = vpop.eup %1174 }
 0x2db   :  { %v1177_v3 = vpop.eup %1176  ;;  %v829_v30 = vadd.f32 1.0, %v1175_v26 }
 0x2dc   :  { %v1179_v5 = vpop.eup %1178  ;;  %v828_v7 = vadd.f32 1.0, %v1177_v3 }
 0x2dd   :  { %v1181_v44 = vpop.eup %1180  ;;  %1188 = vrcp.f32 %v829_v30 }
 0x2de   :  { %1190 = vrcp.f32 %v828_v7 }
 0x2df   :  { %v1183_v11 = vpop.eup %1182 }
 0x2e1   :  { %v1185_v13 = vpop.eup %1184 }
 0x2e3   :  { %v1187_v42 = vpop.eup %1186 }
 0x2e7   :  { %v1189_v14 = vpop.eup %1188 }
 0x2e8   :  { %v1191_v47 = vpop.eup %1190 }

</bundles_post_ra>
